<compile_context>
chip_gen: v7x
topology: tpu7x:2x2x1
jax: 0.10.0
libtpu: 0.0.40
codegen_flags: <defaults>
</compile_context>

<pallas_src>
import math

import jax
import jax.numpy as jnp
from jax.experimental import pallas as pl
from jax.experimental.pallas import tpu as pltpu

_MIB = 1024 * 1024


def _w_contrastive_kernel(x_ref, w_ref, o_ref):
    # One MXU matmul per grid step: x row-tile (tm, d) @ W column-tile (d, tn),
    # f32 accumulation on the MXU, written straight to the output tile
    # (no accumulator scratch, no acc->out copy).
    o_ref[...] = jnp.dot(
        x_ref[...], w_ref[...], preferred_element_type=jnp.float32
    ).astype(o_ref.dtype)


def _round_up(x, m):
    return ((x + m - 1) // m) * m


def _tpu_generation():
    try:
        kind = jax.devices()[0].device_kind.lower()
    except Exception:
        return None
    for gen in ("v7", "v6", "v5"):
        if gen in kind:
            return gen
    return None


def _gen_limits():
    """(tm_cap, vmem_budget_bytes, vmem_limit_bytes) per TPU generation."""
    gen = _tpu_generation()
    if gen == "v7":
        # 64 MiB physical / 32 MiB scoped default -> raise the scoped limit.
        return 16384, 36 * _MIB, 40 * _MIB
    if gen == "v6":
        # 128 MiB physical / 32 MiB scoped default.
        return 8192, 26 * _MIB, 32 * _MIB
    # v5e (16 MiB scoped default) and anything unknown: stay conservative.
    return 4096, 12 * _MIB, None


def _pick_tiles(M, d, itemsize, tm_cap, budget_bytes):
    """Pick (tm, tn) so the double-buffered x/out stream plus the W tile fit
    the VMEM budget.  Prefers a fully resident W (tn == d); tiles W's N
    dimension only when W alone would eat the budget (large d)."""
    # N tile: keep W resident if its double-buffered footprint leaves at least
    # half the budget for the row stream; otherwise halve tn (lane-aligned).
    tn = d
    while tn > 128 and 2 * d * tn * itemsize > budget_bytes // 2:
        tn = max(128, _round_up(tn // 2, 128))
    w_bytes = 2 * d * tn * itemsize
    remaining = budget_bytes - w_bytes

    tm = tm_cap
    while tm > 8 and 2 * tm * (d + tn) * itemsize > remaining:
        tm //= 2
    if 2 * tm * (d + tn) * itemsize > remaining:
        raise ValueError(
            f"W_contrastive: d={d} is too large for the VMEM budget "
            f"({budget_bytes} bytes); a K-tiled fallback would be required."
        )
    # Never tile wider than the (8-aligned) actual row count.
    return max(8, min(tm, _round_up(M, 8))), tn


def w_contrastive_forward(x, W, *, tm=None, tn=None, out_dtype=None):
    """out = x @ W (LightGCL W_contrastive forward) via a Pallas TPU kernel.

    Passing x in bf16 (optionally with a bf16 output) halves HBM traffic on
    this bandwidth-bound kernel while keeping f32 accumulation on the MXU.
    """
    M, K = x.shape
    K2, N = W.shape
    assert K == K2 and K == N, "W must be (d, d) with d == x.shape[-1]"
    d = K
    if out_dtype is None:
        out_dtype = x.dtype

    itemsize = max(
        jnp.dtype(x.dtype).itemsize,
        jnp.dtype(W.dtype).itemsize,
        jnp.dtype(out_dtype).itemsize,
    )
    tm_cap, budget_bytes, vmem_limit = _gen_limits()
    auto_tm, auto_tn = _pick_tiles(M, d, itemsize, tm_cap, budget_bytes)
    tm = auto_tm if tm is None else tm
    tn = auto_tn if tn is None else tn
    assert tm % 8 == 0, "row tile must be sublane-aligned (multiple of 8)"
    assert tn == d or tn % 128 == 0, "N tile must be lane-aligned (x128) or full d"

    grid = (pl.cdiv(M, tm), pl.cdiv(d, tn))   # no padding: partial tail blocks masked

    # Scheduler hint — true (unpadded) flop / byte counts.
    cost = pl.CostEstimate(
        flops=2 * M * d * d,
        transcendentals=0,
        bytes_accessed=(
            M * d * jnp.dtype(x.dtype).itemsize          # x read
            + d * d * jnp.dtype(W.dtype).itemsize        # W read (once when resident)
            + M * d * jnp.dtype(out_dtype).itemsize      # out write
        ),
    )

    compiler_kwargs = dict(dimension_semantics=("parallel", "parallel"))
    if vmem_limit is not None:
        compiler_kwargs["vmem_limit_bytes"] = vmem_limit

    return pl.pallas_call(
        _w_contrastive_kernel,
        out_shape=jax.ShapeDtypeStruct((M, d), out_dtype),
        grid_spec=pl.GridSpec(
            grid=grid,
            in_specs=[
                pl.BlockSpec((tm, d), lambda i, j: (i, 0)),   # x row tile (const over j)
                pl.BlockSpec((d, tn), lambda i, j: (0, j)),   # W tile (resident when tn==d)
            ],
            out_specs=pl.BlockSpec((tm, tn), lambda i, j: (i, j)),
        ),
        compiler_params=pltpu.CompilerParams(**compiler_kwargs),
        cost_estimate=cost,
    )(x, W)


def init_w_contrastive_params(key, d, dtype=jnp.float32):
    # torch.nn.init.xavier_uniform_ on (d, d): U(-a, a), a = sqrt(6 / (d + d))
    bound = math.sqrt(6.0 / (d + d))
    return jax.random.uniform(key, (d, d), dtype=dtype, minval=-bound, maxval=bound)


if __name__ == "__main__":
    key = jax.random.PRNGKey(0)
    k_x, k_w = jax.random.split(key)

    d = 128          # LightGCL embedding dim
    n_rows = 1000    # deliberately NOT a multiple of the forced tile below

    x = jax.random.normal(k_x, (n_rows, d), dtype=jnp.float32)
    W = init_w_contrastive_params(k_w, d)
    ref = x @ W

    # 1) default auto-tiled path (single row block here, W resident).
    out = jax.block_until_ready(w_contrastive_forward(x, W))
    assert out.shape == (n_rows, d)
    assert jnp.allclose(out, ref, atol=1e-4, rtol=1e-4)

    # 2) forced small tile -> non-divisible grid: exercises the masked partial
    #    tail block that replaced the old pad/slice path.
    out_tiled = jax.block_until_ready(w_contrastive_forward(x, W, tm=256))
    assert jnp.allclose(out_tiled, ref, atol=1e-4, rtol=1e-4)

    # 3) opt-in reduced-precision input path: bf16 x / bf16 out, f32 MXU acc.
    out_bf16 = jax.block_until_ready(
        w_contrastive_forward(x.astype(jnp.bfloat16), W, tm=256)
    )
    assert out_bf16.dtype == jnp.bfloat16
    assert jnp.allclose(out_bf16.astype(jnp.float32), ref, atol=5e-2, rtol=5e-2)

    print("KERNEL_OK")
</pallas_src>

<mosaic_0001>
module attributes {stable_mosaic.version = 11 : i64} {
  func.func @_w_contrastive_kernel(%arg0: i32, %arg1: i32, %arg2: memref<1000x128xf32, #tpu.memory_space<vmem>>, %arg3: memref<128x128xf32, #tpu.memory_space<vmem>>, %arg4: memref<1000x128xf32, #tpu.memory_space<vmem>>) attributes {dimension_semantics = [#tpu.dimension_semantics<parallel>, #tpu.dimension_semantics<parallel>], iteration_bounds = array<i64: 1, 1>, scalar_prefetch = 0 : i64, scratch_operands = 0 : i64, tpu.core_type = #tpu.core_type<tc>, window_params = [{transform_indices = @transform_0, window_bounds = array<i64: 1000, 128>}, {transform_indices = @transform_1, window_bounds = array<i64: 128, 128>}, {transform_indices = @transform_2, window_bounds = array<i64: 1000, 128>}]} {
    %c0 = arith.constant 0 : index
    %c0_0 = arith.constant 0 : index
    %0 = vector.load %arg2[%c0, %c0_0] : memref<1000x128xf32, #tpu.memory_space<vmem>>, vector<1000x128xf32>
    %c0_1 = arith.constant 0 : index
    %c0_2 = arith.constant 0 : index
    %1 = vector.load %arg3[%c0_1, %c0_2] : memref<128x128xf32, #tpu.memory_space<vmem>>, vector<128x128xf32>
    %cst = arith.constant dense<0.000000e+00> : vector<1000x128xf32>
    %2 = tpu.matmul %0, %1, %cst {dimension_numbers = #tpu.dot_dimension_numbers<[1], [0], [0], [1], [0, 0, 1, 1], [], []>} : vector<1000x128xf32>, vector<128x128xf32>, vector<1000x128xf32> -> vector<1000x128xf32>
    %c0_3 = arith.constant 0 : index
    %c0_4 = arith.constant 0 : index
    %3 = vector.load %arg4[%c0_3, %c0_4] : memref<1000x128xf32, #tpu.memory_space<vmem>>, vector<1000x128xf32>
    tpu.vector_store %arg4[%c0_3, %c0_4], %2 {strides = array<i32>} : memref<1000x128xf32, #tpu.memory_space<vmem>>, vector<1000x128xf32>,
    return
  }
  func.func @transform_0(%arg0: i32, %arg1: i32) -> (i32, i32) {
    %c0_i32 = arith.constant 0 : i32
    %c0_i32_0 = arith.constant 0 : i32
    return %arg0, %c0_i32 : i32, i32
  }
  func.func @transform_1(%arg0: i32, %arg1: i32) -> (i32, i32) {
    %c0_i32 = arith.constant 0 : i32
    %c0_i32_0 = arith.constant 0 : i32
    return %c0_i32, %arg1 : i32, i32
  }
  func.func @transform_2(%arg0: i32, %arg1: i32) -> (i32, i32) {
    %c0_i32 = arith.constant 0 : i32
    return %arg0, %arg1 : i32, i32
  }
}

</mosaic_0001>

<bundles_post_ra>
// kernel: tpu_custom_call.1
= control target key start
LH: loop header
LB: loop body
LE: loop exit
PB: predicated region body
PF: predicated region fallthrough
CT: control target
= control target key end

     0   :  { %7 = vsyncpa [#allocation3], 0  ;;  %s2000_s0 = inlined_call_operand.hbm [shape: f32[1000,128], index: 0, kind: input, shape index: {}]   ;;  %s2001_s1 = inlined_call_operand.hbm [shape: f32[128,128], index: 1, kind: input, shape index: {}]   ;;  %s2002_s2 = inlined_call_operand.hbm [shape: f32[1000,128], index: 2, kind: output, shape index: {}]  }
   0x1   :  { %8 = vsyncpa [#allocation6], 0 }
   0x2   :  { %9 = vsyncpa [#allocation4], 0  ;;  %s1682_s9 = smov [#allocation2]   ;;  %s1610_s13 = scalar_lea.hbm %s2000_s0, 16000 }
   0x3   :  { %s15_s10 = sshll.u32 %s1682_s9, 4  ;;  %p1611_p0 = scmp.ne.s32.totalorder %s2000_s0, %s1610_s13  ;;  %s16_s10 = int_to_ptr.vmem [resolvable:$true] %s15_s10 }
   0x4   :  { %p1614_p1 = scmp.lt.u32.totalorder %s1610_s13, %s2000_s0 }
   0x6   :  { %p1616_p2 = pnand %p1614_p1, %p1611_p0 }
   0x8   :  { %1619 = shalt.err (!%p1616_p2)
}
   0x9   :  { %s1620_s18 = scalar_lea.vmem %s16_s10, 16000  ;;  %p1625_p4 = scmp.lt.s32.totalorder %s16_s10, %s16_s10 }
   0xa   :  { %p1621_p3 = scmp.ne.s32.totalorder %s16_s10, %s1620_s18  ;;  %p1626_p5 = scmp.lt.s32.totalorder %s1620_s18, %s1620_s18 }
   0xc   :  { %p1627_p6 = por %p1626_p5, %p1625_p4 }
   0xe   :  { %p1628_p7 = pnand %p1627_p6, %p1621_p3 }
  0x10   :  { %1631 = shalt.err (!%p1628_p7)
}
  0x11   :  { %s1683_s19 = smov 128   ;;  %s1684_s20 = smov 8  }
  0x12   :  { %21 = dma.hbm_to_vmem [thread:$0]  %s2000_s0, 16000, %s16_s10, [#allocation3], %s1683_s19, %s1683_s19, %s1684_s20  }
  0x13   :  { %s1685_s23 = smov [#allocation5]   ;;  %s1632_s27 = scalar_lea.hbm %s2001_s1, 2048 }
  0x14   :  { %s27_s24 = sshll.u32 %s1685_s23, 4  ;;  %p1633_p8 = scmp.ne.s32.totalorder %s2001_s1, %s1632_s27  ;;  %s28_s24 = int_to_ptr.vmem [resolvable:$true] %s27_s24 }
  0x15   :  { %p1636_p9 = scmp.lt.u32.totalorder %s1632_s27, %s2001_s1 }
  0x17   :  { %p1638_p10 = pnand %p1636_p9, %p1633_p8 }
  0x19   :  { %1641 = shalt.err (!%p1638_p10)
}
  0x1a   :  { %s1642_s4 = scalar_lea.vmem %s28_s24, 2048  ;;  %p1647_p12 = scmp.lt.s32.totalorder %s28_s24, %s28_s24 }
  0x1b   :  { %p1643_p11 = scmp.ne.s32.totalorder %s28_s24, %s1642_s4  ;;  %p1648_p13 = scmp.lt.s32.totalorder %s1642_s4, %s1642_s4 }
  0x1d   :  { %p1649_p0 = por %p1648_p13, %p1647_p12 }
  0x1f   :  { %p1650_p1 = pnand %p1649_p0, %p1643_p11 }
  0x21   :  { %1653 = shalt.err (!%p1650_p1)
}
  0x22   :  { %33 = dma.hbm_to_vmem [thread:$0]  %s2001_s1, 2048, %s28_s24, [#allocation6], %s1683_s19, %s1683_s19, %s1684_s20  }
  0x23   :  { %1676 = dma.done.wait [#allocation3], 16000  }
  0x24   :  { %1677 = vsyncadd [#allocation3], 4294951296 }
  0x25   :  { %1678 = dma.done.wait [#allocation6], 2048  }
  0x26   :  { %1679 = vsyncadd [#allocation6], 4294965248  ;;  %v1686_v0 = vmov 0.0|0.0   ;;  %vm1687_vm0 = vmmov 0   ;;  %v1688_v1 = vmov 0.0   ;;  %v165_v2 = vld [vmem:[#allocation5] sm:$0xff] }
  0x27   :  { %1562 = vmatprep.subr.bf16.mxu0 %v1686_v0  ;;  %1586 = vmatprep.subr.bf16.mxu1 %v1686_v0  ;;  %v166_v3 = vld [vmem:[#allocation5 + $0x8] sm:$0xff]  ;;  %v167_v4 = vld [vmem:[#allocation5 + $0x10] sm:$0xff]  ;;  %v168_v6 = vld [vmem:[#allocation5 + $0x18] sm:$0xff]  ;;  %s1689_s1 = smov [#allocation7]  }
  0x28   :  { %1187 = vmatprep.mubr.msk.f32.mxu0 %vm1687_vm0, %v1688_v1  ;;  %1376 = vmatprep.mubr.msk.f32.mxu1 %vm1687_vm0, %v1688_v1  ;;  %v1563_v5 = vpack.c.bf16 %v166_v3, %v165_v2  ;;  %v1566_v7 = vpack.c.bf16 %v168_v6, %v167_v4  ;;  %v169_v8 = vld [vmem:[#allocation5 + $0x20] sm:$0xff]  ;;  %v170_v9 = vld [vmem:[#allocation5 + $0x28] sm:$0xff]  ;;  %v171_v11 = vld [vmem:[#allocation5 + $0x30] sm:$0xff]  ;;  %s1001_s6 = sshll.u32 %s1689_s1, 4  ;;  %s1002_s6 = int_to_ptr.vmem [resolvable:$true] %s1001_s6 }
  0x29   :  { %v1569_v10 = vpack.c.bf16 %v170_v9, %v169_v8  ;;  %v172_v12 = vld [vmem:[#allocation5 + $0x38] sm:$0xff]  ;;  %v173_v14 = vld [vmem:[#allocation5 + $0x40] sm:$0xff]  ;;  %v174_v15 = vld [vmem:[#allocation5 + $0x48] sm:$0xff]  ;;  %s1654_s7 = scalar_lea.vmem %s1002_s6, 16000  ;;  %p1659_p3 = scmp.lt.s32.totalorder %s1002_s6, %s1002_s6 }
  0x2a   :  { %1564 = vmatpush3.bf16.msra.mxu0 %v1563_v5  ;;  %1594 = vmatpush3.bf16.msra.mxu1 %v1563_v5  ;;  %v1572_v13 = vpack.c.bf16 %v172_v12, %v171_v11  ;;  %v1575_v16 = vpack.c.bf16 %v174_v15, %v173_v14  ;;  %v175_v17 = vld [vmem:[#allocation5 + $0x50] sm:$0xff]  ;;  %v176_v18 = vld [vmem:[#allocation5 + $0x58] sm:$0xff]  ;;  %v177_v20 = vld [vmem:[#allocation5 + $0x60] sm:$0xff]  ;;  %p1655_p2 = scmp.ne.s32.totalorder %s1002_s6, %s1654_s7  ;;  %p1660_p4 = scmp.lt.s32.totalorder %s1654_s7, %s1654_s7 }
  0x2b   :  { %1565 = vmatprep.subr.bf16.mxu0 %v1686_v0  ;;  %1587 = vmatprep.subr.bf16.mxu1 %v1686_v0  ;;  %v1578_v19 = vpack.c.bf16 %v176_v18, %v175_v17  ;;  %v178_v21 = vld [vmem:[#allocation5 + $0x68] sm:$0xff]  ;;  %v179_v23 = vld [vmem:[#allocation5 + $0x70] sm:$0xff]  ;;  %v180_v24 = vld [vmem:[#allocation5 + $0x78] sm:$0xff] }
  0x2c   :  { %v1581_v22 = vpack.c.bf16 %v178_v21, %v177_v20  ;;  %v1584_v25 = vpack.c.bf16 %v180_v24, %v179_v23  ;;  %v40_v26 = vld [vmem:[#allocation2] sm:$0xff]  ;;  %v103_v27 = vld [vmem:[#allocation2 + $0x1f8] sm:$0xff]  ;;  %v41_v28 = vld [vmem:[#allocation2 + $0x8] sm:$0xff]  ;;  %p1661_p5 = por %p1660_p4, %p1659_p3 }
  0x2d   :  { %v104_v29 = vld [vmem:[#allocation2 + $0x200] sm:$0xff]  ;;  %v42_v30 = vld [vmem:[#allocation2 + $0x10] sm:$0xff]  ;;  %v105_v31 = vld [vmem:[#allocation2 + $0x208] sm:$0xff] }
  0x2e   :  { %1567 = vmatpush3.bf16.msra.mxu0 %v1566_v7  ;;  %1595 = vmatpush3.bf16.msra.mxu1 %v1566_v7  ;;  %v43_v32 = vld [vmem:[#allocation2 + $0x18] sm:$0xff]  ;;  %v106_v33 = vld [vmem:[#allocation2 + $0x210] sm:$0xff]  ;;  %v44_v34 = vld [vmem:[#allocation2 + $0x20] sm:$0xff]  ;;  %p1662_p6 = pnand %p1661_p5, %p1655_p2 }
  0x2f   :  { %1568 = vmatprep.subr.bf16.mxu0 %v1686_v0  ;;  %1588 = vmatprep.subr.bf16.mxu1 %v1686_v0  ;;  %v107_v35 = vld [vmem:[#allocation2 + $0x218] sm:$0xff]  ;;  %v45_v36 = vld [vmem:[#allocation2 + $0x28] sm:$0xff]  ;;  %v108_v37 = vld [vmem:[#allocation2 + $0x220] sm:$0xff] }
  0x30   :  { %v46_v38 = vld [vmem:[#allocation2 + $0x30] sm:$0xff]  ;;  %v109_v39 = vld [vmem:[#allocation2 + $0x228] sm:$0xff]  ;;  %v47_v40 = vld [vmem:[#allocation2 + $0x38] sm:$0xff] }
  0x31   :  { %v110_v41 = vld [vmem:[#allocation2 + $0x230] sm:$0xff]  ;;  %v48_v42 = vld [vmem:[#allocation2 + $0x40] sm:$0xff]  ;;  %v111_v43 = vld [vmem:[#allocation2 + $0x238] sm:$0xff] }
  0x32   :  { %1570 = vmatpush3.bf16.msra.mxu0 %v1569_v10  ;;  %1596 = vmatpush3.bf16.msra.mxu1 %v1569_v10  ;;  %v49_v44 = vld [vmem:[#allocation2 + $0x48] sm:$0xff]  ;;  %v112_v45 = vld [vmem:[#allocation2 + $0x240] sm:$0xff]  ;;  %v50_v46 = vld [vmem:[#allocation2 + $0x50] sm:$0xff] }
  0x33   :  { %1571 = vmatprep.subr.bf16.mxu0 %v1686_v0  ;;  %1589 = vmatprep.subr.bf16.mxu1 %v1686_v0  ;;  %v113_v47 = vld [vmem:[#allocation2 + $0x248] sm:$0xff]  ;;  %v51_v48 = vld [vmem:[#allocation2 + $0x58] sm:$0xff]  ;;  %v114_v49 = vld [vmem:[#allocation2 + $0x250] sm:$0xff] }
  0x34   :  { %v52_v50 = vld [vmem:[#allocation2 + $0x60] sm:$0xff]  ;;  %v115_v51 = vld [vmem:[#allocation2 + $0x258] sm:$0xff]  ;;  %v53_v52 = vld [vmem:[#allocation2 + $0x68] sm:$0xff] }
  0x35   :  { %v116_v53 = vld [vmem:[#allocation2 + $0x260] sm:$0xff]  ;;  %v54_v54 = vld [vmem:[#allocation2 + $0x70] sm:$0xff]  ;;  %v117_v55 = vld [vmem:[#allocation2 + $0x268] sm:$0xff] }
  0x36   :  { %1573 = vmatpush3.bf16.msra.mxu0 %v1572_v13  ;;  %1597 = vmatpush3.bf16.msra.mxu1 %v1572_v13  ;;  %v55_v56 = vld [vmem:[#allocation2 + $0x78] sm:$0xff]  ;;  %v118_v57 = vld [vmem:[#allocation2 + $0x270] sm:$0xff]  ;;  %v56_v58 = vld [vmem:[#allocation2 + $0x80] sm:$0xff] }
  0x37   :  { %1574 = vmatprep.subr.bf16.mxu0 %v1686_v0  ;;  %1590 = vmatprep.subr.bf16.mxu1 %v1686_v0  ;;  %v119_v59 = vld [vmem:[#allocation2 + $0x278] sm:$0xff]  ;;  %v57_v60 = vld [vmem:[#allocation2 + $0x88] sm:$0xff]  ;;  %v120_v61 = vld [vmem:[#allocation2 + $0x280] sm:$0xff] }
  0x38   :  { %v58_v62 = vld [vmem:[#allocation2 + $0x90] sm:$0xff]  ;;  %v121_v63 = vld [vmem:[#allocation2 + $0x288] sm:$0xff]  ;;  %v60_v3 = vld [vmem:[#allocation2 + $0xa0] sm:$0xff] }
  0x39   :  { %v122_v2 = vld [vmem:[#allocation2 + $0x290] sm:$0xff]  ;;  %v123_v4 = vld [vmem:[#allocation2 + $0x298] sm:$0xff]  ;;  %v61_v5 = vld [vmem:[#allocation2 + $0xa8] sm:$0xff] }
  0x3a   :  { %1576 = vmatpush3.bf16.msra.mxu0 %v1575_v16  ;;  %1598 = vmatpush3.bf16.msra.mxu1 %v1575_v16  ;;  %v124_v6 = vld [vmem:[#allocation2 + $0x2a0] sm:$0xff]  ;;  %v62_v7 = vld [vmem:[#allocation2 + $0xb0] sm:$0xff]  ;;  %v125_v8 = vld [vmem:[#allocation2 + $0x2a8] sm:$0xff] }
  0x3b   :  { %1577 = vmatprep.subr.bf16.mxu0 %v1686_v0  ;;  %1591 = vmatprep.subr.bf16.mxu1 %v1686_v0  ;;  %v63_v9 = vld [vmem:[#allocation2 + $0xb8] sm:$0xff]  ;;  %v126_v10 = vld [vmem:[#allocation2 + $0x2b0] sm:$0xff]  ;;  %v64_v11 = vld [vmem:[#allocation2 + $0xc0] sm:$0xff] }
  0x3c   :  { %v127_v12 = vld [vmem:[#allocation2 + $0x2b8] sm:$0xff]  ;;  %v65_v13 = vld [vmem:[#allocation2 + $0xc8] sm:$0xff]  ;;  %v128_v14 = vld [vmem:[#allocation2 + $0x2c0] sm:$0xff] }
  0x3d   :  { %v66_v15 = vld [vmem:[#allocation2 + $0xd0] sm:$0xff]  ;;  %v129_v16 = vld [vmem:[#allocation2 + $0x2c8] sm:$0xff]  ;;  %v67_v17 = vld [vmem:[#allocation2 + $0xd8] sm:$0xff] }
  0x3e   :  { %1579 = vmatpush3.bf16.msra.mxu0 %v1578_v19  ;;  %1599 = vmatpush3.bf16.msra.mxu1 %v1578_v19  ;;  %v130_v18 = vld [vmem:[#allocation2 + $0x2d0] sm:$0xff]  ;;  %v68_v19 = vld [vmem:[#allocation2 + $0xe0] sm:$0xff]  ;;  %v131_v20 = vld [vmem:[#allocation2 + $0x2d8] sm:$0xff] }
  0x3f   :  { %1580 = vmatprep.subr.bf16.mxu0 %v1686_v0  ;;  %1592 = vmatprep.subr.bf16.mxu1 %v1686_v0  ;;  %v69_v21 = vld [vmem:[#allocation2 + $0xe8] sm:$0xff]  ;;  %v70_v23 = vld [vmem:[#allocation2 + $0xf0] sm:$0xff] }
  0x40   :  { %v133_v24 = vld [vmem:[#allocation2 + $0x2e8] sm:$0xff] }
  0x42   :  { %1582 = vmatpush3.bf16.msra.mxu0 %v1581_v22  ;;  %1600 = vmatpush3.bf16.msra.mxu1 %v1581_v22  ;;  %v132_v22 = vld [vmem:[#allocation2 + $0x2e0] sm:$0xff] }
  0x43   :  { %1583 = vmatprep.subr.bf16.mxu0 %v1686_v0  ;;  %1593 = vmatprep.subr.bf16.mxu1 %v1686_v0  ;;  %v59_v0 = vld [vmem:[#allocation2 + $0x98] sm:$0xff] }
  0x46   :  { %1585 = vmatpush3.bf16.msra.mxu0 %v1584_v25  ;;  %1601 = vmatpush3.bf16.msra.mxu1 %v1584_v25  ;;  %v71_v25 = vld [vmem:[#allocation2 + $0xf8] sm:$0xff] }
  0x49   :  { %1188 = vmatmul.mubr.f32.vlgmr.msra.gmra.mrb[0].mxu0 %v40_v26  ;;  %1377 = vmatmul.mubr.f32.vlgmr.msra.gmra.mrb[0].mxu1 %v103_v27  ;;  %v134_v26 = vld [vmem:[#allocation2 + $0x2f0] sm:$0xff]  ;;  %v72_v27 = vld [vmem:[#allocation2 + $0x100] sm:$0xff] }
  0x4a   :  { %1190 = vmatprep.mubr.msk.f32.mxu0 %vm1687_vm0, %v1688_v1  ;;  %1379 = vmatprep.mubr.msk.f32.mxu1 %vm1687_vm0, %v1688_v1 }
  0x4d   :  { %1191 = vmatmul.mubr.f32.gmra.mrb[2].mxu0 %v41_v28  ;;  %1380 = vmatmul.mubr.f32.gmra.mrb[2].mxu1 %v104_v29  ;;  %v135_v28 = vld [vmem:[#allocation2 + $0x2f8] sm:$0xff]  ;;  %v73_v29 = vld [vmem:[#allocation2 + $0x108] sm:$0xff] }
  0x4e   :  { %1193 = vmatprep.mubr.msk.f32.mxu0 %vm1687_vm0, %v1688_v1  ;;  %1382 = vmatprep.mubr.msk.f32.mxu1 %vm1687_vm0, %v1688_v1 }
  0x51   :  { %1194 = vmatmul.mubr.f32.gmra.mrb[4].mxu0 %v42_v30  ;;  %1383 = vmatmul.mubr.f32.gmra.mrb[4].mxu1 %v105_v31  ;;  %v136_v30 = vld [vmem:[#allocation2 + $0x300] sm:$0xff]  ;;  %v74_v31 = vld [vmem:[#allocation2 + $0x110] sm:$0xff] }
  0x52   :  { %1196 = vmatprep.mubr.msk.f32.mxu0 %vm1687_vm0, %v1688_v1  ;;  %1385 = vmatprep.mubr.msk.f32.mxu1 %vm1687_vm0, %v1688_v1 }
  0x55   :  { %1197 = vmatmul.mubr.f32.gmra.mrb[6].mxu0 %v43_v32  ;;  %1386 = vmatmul.mubr.f32.gmra.mrb[6].mxu1 %v106_v33  ;;  %v137_v32 = vld [vmem:[#allocation2 + $0x308] sm:$0xff]  ;;  %v75_v33 = vld [vmem:[#allocation2 + $0x118] sm:$0xff] }
  0x56   :  { %1199 = vmatprep.mubr.msk.f32.mxu0 %vm1687_vm0, %v1688_v1  ;;  %1388 = vmatprep.mubr.msk.f32.mxu1 %vm1687_vm0, %v1688_v1 }
  0x59   :  { %1200 = vmatmul.mubr.f32.gmra.mrb[8].mxu0 %v44_v34  ;;  %1389 = vmatmul.mubr.f32.gmra.mrb[8].mxu1 %v107_v35  ;;  %v138_v34 = vld [vmem:[#allocation2 + $0x310] sm:$0xff]  ;;  %v76_v35 = vld [vmem:[#allocation2 + $0x120] sm:$0xff] }
  0x5a   :  { %1202 = vmatprep.mubr.msk.f32.mxu0 %vm1687_vm0, %v1688_v1  ;;  %1391 = vmatprep.mubr.msk.f32.mxu1 %vm1687_vm0, %v1688_v1 }
  0x5d   :  { %1203 = vmatmul.mubr.f32.gmra.mrb[10].mxu0 %v45_v36  ;;  %1392 = vmatmul.mubr.f32.gmra.mrb[10].mxu1 %v108_v37  ;;  %v139_v36 = vld [vmem:[#allocation2 + $0x318] sm:$0xff]  ;;  %v77_v37 = vld [vmem:[#allocation2 + $0x128] sm:$0xff] }
  0x5e   :  { %1205 = vmatprep.mubr.msk.f32.mxu0 %vm1687_vm0, %v1688_v1  ;;  %1394 = vmatprep.mubr.msk.f32.mxu1 %vm1687_vm0, %v1688_v1 }
  0x61   :  { %1206 = vmatmul.mubr.f32.gmra.mrb[12].mxu0 %v46_v38  ;;  %1395 = vmatmul.mubr.f32.gmra.mrb[12].mxu1 %v109_v39  ;;  %v140_v38 = vld [vmem:[#allocation2 + $0x320] sm:$0xff]  ;;  %v78_v39 = vld [vmem:[#allocation2 + $0x130] sm:$0xff] }
  0x62   :  { %1208 = vmatprep.mubr.msk.f32.mxu0 %vm1687_vm0, %v1688_v1  ;;  %1397 = vmatprep.mubr.msk.f32.mxu1 %vm1687_vm0, %v1688_v1 }
  0x65   :  { %1209 = vmatmul.mubr.f32.gmra.mrb[14].mxu0 %v47_v40  ;;  %1398 = vmatmul.mubr.f32.gmra.mrb[14].mxu1 %v110_v41  ;;  %v141_v40 = vld [vmem:[#allocation2 + $0x328] sm:$0xff]  ;;  %v79_v41 = vld [vmem:[#allocation2 + $0x138] sm:$0xff] }
  0x66   :  { %1211 = vmatprep.mubr.msk.f32.mxu0 %vm1687_vm0, %v1688_v1  ;;  %1400 = vmatprep.mubr.msk.f32.mxu1 %vm1687_vm0, %v1688_v1 }
  0x69   :  { %1212 = vmatmul.mubr.f32.gmra.mrb[16].mxu0 %v48_v42  ;;  %1401 = vmatmul.mubr.f32.gmra.mrb[16].mxu1 %v111_v43  ;;  %v142_v42 = vld [vmem:[#allocation2 + $0x330] sm:$0xff]  ;;  %v80_v43 = vld [vmem:[#allocation2 + $0x140] sm:$0xff] }
  0x6a   :  { %1214 = vmatprep.mubr.msk.f32.mxu0 %vm1687_vm0, %v1688_v1  ;;  %1403 = vmatprep.mubr.msk.f32.mxu1 %vm1687_vm0, %v1688_v1 }
  0x6d   :  { %1215 = vmatmul.mubr.f32.gmra.mrb[18].mxu0 %v49_v44  ;;  %1404 = vmatmul.mubr.f32.gmra.mrb[18].mxu1 %v112_v45  ;;  %v143_v44 = vld [vmem:[#allocation2 + $0x338] sm:$0xff]  ;;  %v81_v45 = vld [vmem:[#allocation2 + $0x148] sm:$0xff] }
  0x6e   :  { %1217 = vmatprep.mubr.msk.f32.mxu0 %vm1687_vm0, %v1688_v1  ;;  %1406 = vmatprep.mubr.msk.f32.mxu1 %vm1687_vm0, %v1688_v1 }
  0x71   :  { %1218 = vmatmul.mubr.f32.gmra.mrb[20].mxu0 %v50_v46  ;;  %1407 = vmatmul.mubr.f32.gmra.mrb[20].mxu1 %v113_v47  ;;  %v144_v46 = vld [vmem:[#allocation2 + $0x340] sm:$0xff]  ;;  %v82_v47 = vld [vmem:[#allocation2 + $0x150] sm:$0xff] }
  0x72   :  { %1220 = vmatprep.mubr.msk.f32.mxu0 %vm1687_vm0, %v1688_v1  ;;  %1409 = vmatprep.mubr.msk.f32.mxu1 %vm1687_vm0, %v1688_v1 }
  0x75   :  { %1221 = vmatmul.mubr.f32.gmra.mrb[22].mxu0 %v51_v48  ;;  %1410 = vmatmul.mubr.f32.gmra.mrb[22].mxu1 %v114_v49  ;;  %v145_v48 = vld [vmem:[#allocation2 + $0x348] sm:$0xff]  ;;  %v83_v49 = vld [vmem:[#allocation2 + $0x158] sm:$0xff] }
  0x76   :  { %1223 = vmatprep.mubr.msk.f32.mxu0 %vm1687_vm0, %v1688_v1  ;;  %1412 = vmatprep.mubr.msk.f32.mxu1 %vm1687_vm0, %v1688_v1 }
  0x79   :  { %1224 = vmatmul.mubr.f32.gmra.mrb[24].mxu0 %v52_v50  ;;  %1413 = vmatmul.mubr.f32.gmra.mrb[24].mxu1 %v115_v51  ;;  %v146_v50 = vld [vmem:[#allocation2 + $0x350] sm:$0xff]  ;;  %v84_v51 = vld [vmem:[#allocation2 + $0x160] sm:$0xff] }
  0x7a   :  { %1226 = vmatprep.mubr.msk.f32.mxu0 %vm1687_vm0, %v1688_v1  ;;  %1415 = vmatprep.mubr.msk.f32.mxu1 %vm1687_vm0, %v1688_v1 }
  0x7d   :  { %1227 = vmatmul.mubr.f32.gmra.mrb[26].mxu0 %v53_v52  ;;  %1416 = vmatmul.mubr.f32.gmra.mrb[26].mxu1 %v116_v53  ;;  %v147_v52 = vld [vmem:[#allocation2 + $0x358] sm:$0xff]  ;;  %v85_v53 = vld [vmem:[#allocation2 + $0x168] sm:$0xff] }
  0x7e   :  { %1229 = vmatprep.mubr.msk.f32.mxu0 %vm1687_vm0, %v1688_v1  ;;  %1418 = vmatprep.mubr.msk.f32.mxu1 %vm1687_vm0, %v1688_v1 }
  0x81   :  { %1230 = vmatmul.mubr.f32.gmra.mrb[28].mxu0 %v54_v54  ;;  %1419 = vmatmul.mubr.f32.gmra.mrb[28].mxu1 %v117_v55  ;;  %v148_v54 = vld [vmem:[#allocation2 + $0x360] sm:$0xff]  ;;  %v86_v55 = vld [vmem:[#allocation2 + $0x170] sm:$0xff] }
  0x82   :  { %1232 = vmatprep.mubr.msk.f32.mxu0 %vm1687_vm0, %v1688_v1  ;;  %1421 = vmatprep.mubr.msk.f32.mxu1 %vm1687_vm0, %v1688_v1 }
  0x85   :  { %1233 = vmatmul.mubr.f32.gmra.mrb[30].mxu0 %v55_v56  ;;  %1422 = vmatmul.mubr.f32.gmra.mrb[30].mxu1 %v118_v57  ;;  %v149_v56 = vld [vmem:[#allocation2 + $0x368] sm:$0xff]  ;;  %v87_v57 = vld [vmem:[#allocation2 + $0x178] sm:$0xff] }
  0x86   :  { %1235 = vmatprep.mubr.msk.f32.mxu0 %vm1687_vm0, %v1688_v1  ;;  %1424 = vmatprep.mubr.msk.f32.mxu1 %vm1687_vm0, %v1688_v1 }
  0x89   :  { %1236 = vmatmul.mubr.f32.gmra.mrb[32].mxu0 %v56_v58  ;;  %1425 = vmatmul.mubr.f32.gmra.mrb[32].mxu1 %v119_v59  ;;  %v150_v58 = vld [vmem:[#allocation2 + $0x370] sm:$0xff]  ;;  %v88_v59 = vld [vmem:[#allocation2 + $0x180] sm:$0xff] }
  0x8a   :  { %1238 = vmatprep.mubr.msk.f32.mxu0 %vm1687_vm0, %v1688_v1  ;;  %1427 = vmatprep.mubr.msk.f32.mxu1 %vm1687_vm0, %v1688_v1 }
  0x8d   :  { %1239 = vmatmul.mubr.f32.gmra.mrb[34].mxu0 %v57_v60  ;;  %1428 = vmatmul.mubr.f32.gmra.mrb[34].mxu1 %v120_v61  ;;  %v151_v60 = vld [vmem:[#allocation2 + $0x378] sm:$0xff]  ;;  %v89_v61 = vld [vmem:[#allocation2 + $0x188] sm:$0xff] }
  0x8e   :  { %1241 = vmatprep.mubr.msk.f32.mxu0 %vm1687_vm0, %v1688_v1  ;;  %1430 = vmatprep.mubr.msk.f32.mxu1 %vm1687_vm0, %v1688_v1 }
  0x91   :  { %1242 = vmatmul.mubr.f32.gmra.mrb[36].mxu0 %v58_v62  ;;  %1431 = vmatmul.mubr.f32.gmra.mrb[36].mxu1 %v121_v63  ;;  %v152_v62 = vld [vmem:[#allocation2 + $0x380] sm:$0xff]  ;;  %v90_v63 = vld [vmem:[#allocation2 + $0x190] sm:$0xff] }
  0x92   :  { %1244 = vmatprep.mubr.msk.f32.mxu0 %vm1687_vm0, %v1688_v1  ;;  %1433 = vmatprep.mubr.msk.f32.mxu1 %vm1687_vm0, %v1688_v1 }
  0x95   :  { %1245 = vmatmul.mubr.f32.gmra.mrb[38].mxu0 %v59_v0  ;;  %1434 = vmatmul.mubr.f32.gmra.mrb[38].mxu1 %v122_v2  ;;  %v153_v0 = vld [vmem:[#allocation2 + $0x388] sm:$0xff]  ;;  %v91_v2 = vld [vmem:[#allocation2 + $0x198] sm:$0xff] }
  0x96   :  { %1247 = vmatprep.mubr.msk.f32.mxu0 %vm1687_vm0, %v1688_v1  ;;  %1436 = vmatprep.mubr.msk.f32.mxu1 %vm1687_vm0, %v1688_v1 }
  0x99   :  { %1248 = vmatmul.mubr.f32.gmra.mrb[40].mxu0 %v60_v3  ;;  %1437 = vmatmul.mubr.f32.gmra.mrb[40].mxu1 %v123_v4  ;;  %v154_v3 = vld [vmem:[#allocation2 + $0x390] sm:$0xff]  ;;  %v92_v4 = vld [vmem:[#allocation2 + $0x1a0] sm:$0xff] }
  0x9a   :  { %1250 = vmatprep.mubr.msk.f32.mxu0 %vm1687_vm0, %v1688_v1  ;;  %1439 = vmatprep.mubr.msk.f32.mxu1 %vm1687_vm0, %v1688_v1 }
  0x9d   :  { %1251 = vmatmul.mubr.f32.gmra.mrb[42].mxu0 %v61_v5  ;;  %1440 = vmatmul.mubr.f32.gmra.mrb[42].mxu1 %v124_v6  ;;  %v155_v5 = vld [vmem:[#allocation2 + $0x398] sm:$0xff]  ;;  %v93_v6 = vld [vmem:[#allocation2 + $0x1a8] sm:$0xff] }
  0x9e   :  { %1253 = vmatprep.mubr.msk.f32.mxu0 %vm1687_vm0, %v1688_v1  ;;  %1442 = vmatprep.mubr.msk.f32.mxu1 %vm1687_vm0, %v1688_v1 }
  0xa1   :  { %1254 = vmatmul.mubr.f32.gmra.mrb[44].mxu0 %v62_v7  ;;  %1443 = vmatmul.mubr.f32.gmra.mrb[44].mxu1 %v125_v8  ;;  %v156_v7 = vld [vmem:[#allocation2 + $0x3a0] sm:$0xff] }
  0xa2   :  { %1256 = vmatprep.mubr.msk.f32.mxu0 %vm1687_vm0, %v1688_v1  ;;  %1445 = vmatprep.mubr.msk.f32.mxu1 %vm1687_vm0, %v1688_v1 }
  0xa5   :  { %1257 = vmatmul.mubr.f32.gmra.mrb[46].mxu0 %v63_v9  ;;  %1446 = vmatmul.mubr.f32.gmra.mrb[46].mxu1 %v126_v10 }
  0xa6   :  { %1259 = vmatprep.mubr.msk.f32.mxu0 %vm1687_vm0, %v1688_v1  ;;  %1448 = vmatprep.mubr.msk.f32.mxu1 %vm1687_vm0, %v1688_v1 }
  0xa9   :  { %1260 = vmatmul.mubr.f32.gmra.mrb[48].mxu0 %v64_v11  ;;  %1449 = vmatmul.mubr.f32.gmra.mrb[48].mxu1 %v127_v12  ;;  %v94_v12 = vld [vmem:[#allocation2 + $0x1b0] sm:$0xff] }
  0xaa   :  { %1262 = vmatprep.mubr.msk.f32.mxu0 %vm1687_vm0, %v1688_v1  ;;  %1451 = vmatprep.mubr.msk.f32.mxu1 %vm1687_vm0, %v1688_v1 }
  0xad   :  { %1263 = vmatmul.mubr.f32.gmra.mrb[50].mxu0 %v65_v13  ;;  %1452 = vmatmul.mubr.f32.gmra.mrb[50].mxu1 %v128_v14  ;;  %v157_v13 = vld [vmem:[#allocation2 + $0x3a8] sm:$0xff] }
  0xae   :  { %1265 = vmatprep.mubr.msk.f32.mxu0 %vm1687_vm0, %v1688_v1  ;;  %1454 = vmatprep.mubr.msk.f32.mxu1 %vm1687_vm0, %v1688_v1 }
  0xb1   :  { %1266 = vmatmul.mubr.f32.gmra.mrb[52].mxu0 %v66_v15  ;;  %1455 = vmatmul.mubr.f32.gmra.mrb[52].mxu1 %v129_v16 }
  0xb2   :  { %1268 = vmatprep.mubr.msk.f32.mxu0 %vm1687_vm0, %v1688_v1  ;;  %1457 = vmatprep.mubr.msk.f32.mxu1 %vm1687_vm0, %v1688_v1 }
  0xb5   :  { %1269 = vmatmul.mubr.f32.gmra.mrb[54].mxu0 %v67_v17  ;;  %1458 = vmatmul.mubr.f32.gmra.mrb[54].mxu1 %v130_v18  ;;  %v95_v18 = vld [vmem:[#allocation2 + $0x1b8] sm:$0xff] }
  0xb6   :  { %1271 = vmatprep.mubr.msk.f32.mxu0 %vm1687_vm0, %v1688_v1  ;;  %1460 = vmatprep.mubr.msk.f32.mxu1 %vm1687_vm0, %v1688_v1 }
  0xb9   :  { %1272 = vmatmul.mubr.f32.gmra.mrb[56].mxu0 %v68_v19  ;;  %1461 = vmatmul.mubr.f32.gmra.mrb[56].mxu1 %v131_v20  ;;  %v158_v19 = vld [vmem:[#allocation2 + $0x3b0] sm:$0xff] }
  0xba   :  { %1274 = vmatprep.mubr.msk.f32.mxu0 %vm1687_vm0, %v1688_v1  ;;  %1463 = vmatprep.mubr.msk.f32.mxu1 %vm1687_vm0, %v1688_v1 }
  0xbd   :  { %1275 = vmatmul.mubr.f32.gmra.mrb[58].mxu0 %v69_v21  ;;  %1464 = vmatmul.mubr.f32.gmra.mrb[58].mxu1 %v132_v22 }
  0xbe   :  { %1277 = vmatprep.mubr.msk.f32.mxu0 %vm1687_vm0, %v1688_v1  ;;  %1466 = vmatprep.mubr.msk.f32.mxu1 %vm1687_vm0, %v1688_v1 }
  0xc1   :  { %1278 = vmatmul.mubr.f32.gmra.mrb[60].mxu0 %v70_v23  ;;  %1467 = vmatmul.mubr.f32.gmra.mrb[60].mxu1 %v133_v24  ;;  %v96_v24 = vld [vmem:[#allocation2 + $0x1c0] sm:$0xff] }
  0xc2   :  { %1280 = vmatprep.mubr.msk.f32.mxu0 %vm1687_vm0, %v1688_v1  ;;  %1469 = vmatprep.mubr.msk.f32.mxu1 %vm1687_vm0, %v1688_v1 }
  0xc5   :  { %1281 = vmatmul.mubr.f32.gmra.mrb[62].mxu0 %v71_v25  ;;  %1470 = vmatmul.mubr.f32.gmra.mrb[62].mxu1 %v134_v26  ;;  %v159_v25 = vld [vmem:[#allocation2 + $0x3b8] sm:$0xff] }
  0xc6   :  { %1283 = vmatprep.mubr.msk.f32.mxu0 %vm1687_vm0, %v1688_v1  ;;  %1472 = vmatprep.mubr.msk.f32.mxu1 %vm1687_vm0, %v1688_v1 }
  0xc9   :  { %1284 = vmatmul.mubr.f32.gmra.mrb[64].mxu0 %v72_v27  ;;  %1473 = vmatmul.mubr.f32.gmra.mrb[64].mxu1 %v135_v28 }
  0xca   :  { %1286 = vmatprep.mubr.msk.f32.mxu0 %vm1687_vm0, %v1688_v1  ;;  %1475 = vmatprep.mubr.msk.f32.mxu1 %vm1687_vm0, %v1688_v1 }
  0xcd   :  { %1287 = vmatmul.mubr.f32.gmra.mrb[66].mxu0 %v73_v29  ;;  %1476 = vmatmul.mubr.f32.gmra.mrb[66].mxu1 %v136_v30  ;;  %v97_v30 = vld [vmem:[#allocation2 + $0x1c8] sm:$0xff] }
  0xce   :  { %1289 = vmatprep.mubr.msk.f32.mxu0 %vm1687_vm0, %v1688_v1  ;;  %1478 = vmatprep.mubr.msk.f32.mxu1 %vm1687_vm0, %v1688_v1 }
  0xd1   :  { %1290 = vmatmul.mubr.f32.gmra.mrb[68].mxu0 %v74_v31  ;;  %1479 = vmatmul.mubr.f32.gmra.mrb[68].mxu1 %v137_v32  ;;  %v160_v31 = vld [vmem:[#allocation2 + $0x3c0] sm:$0xff] }
  0xd2   :  { %1292 = vmatprep.mubr.msk.f32.mxu0 %vm1687_vm0, %v1688_v1  ;;  %1481 = vmatprep.mubr.msk.f32.mxu1 %vm1687_vm0, %v1688_v1 }
  0xd5   :  { %1293 = vmatmul.mubr.f32.gmra.mrb[70].mxu0 %v75_v33  ;;  %1482 = vmatmul.mubr.f32.gmra.mrb[70].mxu1 %v138_v34 }
  0xd6   :  { %1295 = vmatprep.mubr.msk.f32.mxu0 %vm1687_vm0, %v1688_v1  ;;  %1484 = vmatprep.mubr.msk.f32.mxu1 %vm1687_vm0, %v1688_v1 }
  0xd9   :  { %1296 = vmatmul.mubr.f32.gmra.mrb[72].mxu0 %v76_v35  ;;  %1485 = vmatmul.mubr.f32.gmra.mrb[72].mxu1 %v139_v36  ;;  %v98_v36 = vld [vmem:[#allocation2 + $0x1d0] sm:$0xff] }
  0xda   :  { %1298 = vmatprep.mubr.msk.f32.mxu0 %vm1687_vm0, %v1688_v1  ;;  %1487 = vmatprep.mubr.msk.f32.mxu1 %vm1687_vm0, %v1688_v1 }
  0xdd   :  { %1299 = vmatmul.mubr.f32.gmra.mrb[74].mxu0 %v77_v37  ;;  %1488 = vmatmul.mubr.f32.gmra.mrb[74].mxu1 %v140_v38  ;;  %v161_v37 = vld [vmem:[#allocation2 + $0x3c8] sm:$0xff] }
  0xde   :  { %1301 = vmatprep.mubr.msk.f32.mxu0 %vm1687_vm0, %v1688_v1  ;;  %1490 = vmatprep.mubr.msk.f32.mxu1 %vm1687_vm0, %v1688_v1 }
  0xe1   :  { %1302 = vmatmul.mubr.f32.gmra.mrb[76].mxu0 %v78_v39  ;;  %1491 = vmatmul.mubr.f32.gmra.mrb[76].mxu1 %v141_v40 }
  0xe2   :  { %1304 = vmatprep.mubr.msk.f32.mxu0 %vm1687_vm0, %v1688_v1  ;;  %1493 = vmatprep.mubr.msk.f32.mxu1 %vm1687_vm0, %v1688_v1 }
  0xe5   :  { %1305 = vmatmul.mubr.f32.gmra.mrb[78].mxu0 %v79_v41  ;;  %1494 = vmatmul.mubr.f32.gmra.mrb[78].mxu1 %v142_v42  ;;  %v99_v42 = vld [vmem:[#allocation2 + $0x1d8] sm:$0xff] }
  0xe6   :  { %1307 = vmatprep.mubr.msk.f32.mxu0 %vm1687_vm0, %v1688_v1  ;;  %1496 = vmatprep.mubr.msk.f32.mxu1 %vm1687_vm0, %v1688_v1 }
  0xe9   :  { %1308 = vmatmul.mubr.f32.gmra.mrb[80].mxu0 %v80_v43  ;;  %1497 = vmatmul.mubr.f32.gmra.mrb[80].mxu1 %v143_v44  ;;  %v162_v43 = vld [vmem:[#allocation2 + $0x3d0] sm:$0xff] }
  0xea   :  { %1310 = vmatprep.mubr.msk.f32.mxu0 %vm1687_vm0, %v1688_v1  ;;  %1499 = vmatprep.mubr.msk.f32.mxu1 %vm1687_vm0, %v1688_v1 }
  0xed   :  { %1311 = vmatmul.mubr.f32.gmra.mrb[82].mxu0 %v81_v45  ;;  %1500 = vmatmul.mubr.f32.gmra.mrb[82].mxu1 %v144_v46 }
  0xee   :  { %1313 = vmatprep.mubr.msk.f32.mxu0 %vm1687_vm0, %v1688_v1  ;;  %1502 = vmatprep.mubr.msk.f32.mxu1 %vm1687_vm0, %v1688_v1 }
  0xf1   :  { %1314 = vmatmul.mubr.f32.gmra.mrb[84].mxu0 %v82_v47  ;;  %1503 = vmatmul.mubr.f32.gmra.mrb[84].mxu1 %v145_v48  ;;  %v100_v48 = vld [vmem:[#allocation2 + $0x1e0] sm:$0xff] }
  0xf2   :  { %1316 = vmatprep.mubr.msk.f32.mxu0 %vm1687_vm0, %v1688_v1  ;;  %1505 = vmatprep.mubr.msk.f32.mxu1 %vm1687_vm0, %v1688_v1 }
  0xf5   :  { %1317 = vmatmul.mubr.f32.gmra.mrb[86].mxu0 %v83_v49  ;;  %1506 = vmatmul.mubr.f32.gmra.mrb[86].mxu1 %v146_v50  ;;  %v163_v49 = vld [vmem:[#allocation2 + $0x3d8] sm:$0xff] }
  0xf6   :  { %1319 = vmatprep.mubr.msk.f32.mxu0 %vm1687_vm0, %v1688_v1  ;;  %1508 = vmatprep.mubr.msk.f32.mxu1 %vm1687_vm0, %v1688_v1 }
  0xf9   :  { %1320 = vmatmul.mubr.f32.gmra.mrb[88].mxu0 %v84_v51  ;;  %1509 = vmatmul.mubr.f32.gmra.mrb[88].mxu1 %v147_v52 }
  0xfa   :  { %1322 = vmatprep.mubr.msk.f32.mxu0 %vm1687_vm0, %v1688_v1  ;;  %1511 = vmatprep.mubr.msk.f32.mxu1 %vm1687_vm0, %v1688_v1 }
  0xfd   :  { %1323 = vmatmul.mubr.f32.gmra.mrb[90].mxu0 %v85_v53  ;;  %1512 = vmatmul.mubr.f32.gmra.mrb[90].mxu1 %v148_v54  ;;  %v101_v54 = vld [vmem:[#allocation2 + $0x1e8] sm:$0xff] }
  0xfe   :  { %1325 = vmatprep.mubr.msk.f32.mxu0 %vm1687_vm0, %v1688_v1  ;;  %1514 = vmatprep.mubr.msk.f32.mxu1 %vm1687_vm0, %v1688_v1 }
 0x101   :  { %1326 = vmatmul.mubr.f32.gmra.mrb[92].mxu0 %v86_v55  ;;  %1515 = vmatmul.mubr.f32.gmra.mrb[92].mxu1 %v149_v56  ;;  %v164_v55 = vld [vmem:[#allocation2 + $0x3e0] sm:$0xff] }
 0x102   :  { %1328 = vmatprep.mubr.msk.f32.mxu0 %vm1687_vm0, %v1688_v1  ;;  %1517 = vmatprep.mubr.msk.f32.mxu1 %vm1687_vm0, %v1688_v1 }
 0x105   :  { %1329 = vmatmul.mubr.f32.gmra.mrb[94].mxu0 %v87_v57  ;;  %1518 = vmatmul.mubr.f32.gmra.mrb[94].mxu1 %v150_v58 }
 0x106   :  { %1331 = vmatprep.mubr.msk.f32.mxu0 %vm1687_vm0, %v1688_v1  ;;  %1520 = vmatprep.mubr.msk.f32.mxu1 %vm1687_vm0, %v1688_v1 }
 0x109   :  { %1332 = vmatmul.mubr.f32.gmra.mrb[96].mxu0 %v88_v59  ;;  %1521 = vmatmul.mubr.f32.gmra.mrb[96].mxu1 %v151_v60  ;;  %v102_v60 = vld [vmem:[#allocation2 + $0x1f0] sm:$0xff] }
 0x10a   :  { %1334 = vmatprep.mubr.msk.f32.mxu0 %vm1687_vm0, %v1688_v1  ;;  %1523 = vmatprep.mubr.msk.f32.mxu1 %vm1687_vm0, %v1688_v1 }
 0x10d   :  { %1335 = vmatmul.mubr.f32.gmra.mrb[98].mxu0 %v89_v61  ;;  %1524 = vmatmul.mubr.f32.gmra.mrb[98].mxu1 %v152_v62 }
 0x10e   :  { %1337 = vmatprep.mubr.msk.f32.mxu0 %vm1687_vm0, %v1688_v1  ;;  %1526 = vmatprep.mubr.msk.f32.mxu1 %vm1687_vm0, %v1688_v1 }
 0x111   :  { %1338 = vmatmul.mubr.f32.gmra.mrb[100].mxu0 %v90_v63  ;;  %1527 = vmatmul.mubr.f32.gmra.mrb[100].mxu1 %v153_v0 }
 0x112   :  { %1340 = vmatprep.mubr.msk.f32.mxu0 %vm1687_vm0, %v1688_v1  ;;  %1529 = vmatprep.mubr.msk.f32.mxu1 %vm1687_vm0, %v1688_v1 }
 0x115   :  { %1341 = vmatmul.mubr.f32.gmra.mrb[102].mxu0 %v91_v2  ;;  %1530 = vmatmul.mubr.f32.gmra.mrb[102].mxu1 %v154_v3 }
 0x116   :  { %1343 = vmatprep.mubr.msk.f32.mxu0 %vm1687_vm0, %v1688_v1  ;;  %1532 = vmatprep.mubr.msk.f32.mxu1 %vm1687_vm0, %v1688_v1 }
 0x119   :  { %1344 = vmatmul.mubr.f32.gmra.mrb[104].mxu0 %v92_v4  ;;  %1533 = vmatmul.mubr.f32.gmra.mrb[104].mxu1 %v155_v5 }
 0x11a   :  { %1346 = vmatprep.mubr.msk.f32.mxu0 %vm1687_vm0, %v1688_v1  ;;  %1535 = vmatprep.mubr.msk.f32.mxu1 %vm1687_vm0, %v1688_v1 }
 0x11c   :  { %v247_v8 = vpop.f32.mrb[0].mxu0  ;;  %v562_v9 = vpop.f32.mrb[0].mxu1 }
 0x11d   :  { %871 = vst [vmem:[#allocation7] sm:$0xff] %v247_v8  ;;  %v1189_v10 = vpop.f32.mrb[1].mxu0  ;;  %1347 = vmatmul.mubr.f32.gmra.mrb[106].mxu0 %v93_v6  ;;  %934 = vst [vmem:[#allocation7 + $0x1f8] sm:$0xff] %v562_v9  ;;  %v1378_v11 = vpop.f32.mrb[1].mxu1  ;;  %1536 = vmatmul.mubr.f32.gmra.mrb[106].mxu1 %v156_v7 }
 0x11e   :  { %1349 = vmatprep.mubr.msk.f32.mxu0 %vm1687_vm0, %v1688_v1  ;;  %1538 = vmatprep.mubr.msk.f32.mxu1 %vm1687_vm0, %v1688_v1 }
 0x120   :  { %v252_v14 = vpop.f32.mrb[2].mxu0  ;;  %v567_v15 = vpop.f32.mrb[2].mxu1 }
 0x121   :  { %872 = vst [vmem:[#allocation7 + $0x8] sm:$0xff] %v252_v14  ;;  %v1192_v16 = vpop.f32.mrb[3].mxu0  ;;  %1350 = vmatmul.mubr.f32.gmra.mrb[108].mxu0 %v94_v12  ;;  %935 = vst [vmem:[#allocation7 + $0x200] sm:$0xff] %v567_v15  ;;  %v1381_v17 = vpop.f32.mrb[3].mxu1  ;;  %1539 = vmatmul.mubr.f32.gmra.mrb[108].mxu1 %v157_v13 }
 0x122   :  { %1352 = vmatprep.mubr.msk.f32.mxu0 %vm1687_vm0, %v1688_v1  ;;  %1541 = vmatprep.mubr.msk.f32.mxu1 %vm1687_vm0, %v1688_v1 }
 0x124   :  { %v257_v20 = vpop.f32.mrb[4].mxu0  ;;  %v572_v21 = vpop.f32.mrb[4].mxu1 }
 0x125   :  { %873 = vst [vmem:[#allocation7 + $0x10] sm:$0xff] %v257_v20  ;;  %v1195_v22 = vpop.f32.mrb[5].mxu0  ;;  %1353 = vmatmul.mubr.f32.gmra.mrb[110].mxu0 %v95_v18  ;;  %936 = vst [vmem:[#allocation7 + $0x208] sm:$0xff] %v572_v21  ;;  %v1384_v23 = vpop.f32.mrb[5].mxu1  ;;  %1542 = vmatmul.mubr.f32.gmra.mrb[110].mxu1 %v158_v19 }
 0x126   :  { %1355 = vmatprep.mubr.msk.f32.mxu0 %vm1687_vm0, %v1688_v1  ;;  %1544 = vmatprep.mubr.msk.f32.mxu1 %vm1687_vm0, %v1688_v1 }
 0x128   :  { %v262_v26 = vpop.f32.mrb[6].mxu0  ;;  %v577_v27 = vpop.f32.mrb[6].mxu1 }
 0x129   :  { %874 = vst [vmem:[#allocation7 + $0x18] sm:$0xff] %v262_v26  ;;  %v1198_v28 = vpop.f32.mrb[7].mxu0  ;;  %1356 = vmatmul.mubr.f32.gmra.mrb[112].mxu0 %v96_v24  ;;  %937 = vst [vmem:[#allocation7 + $0x210] sm:$0xff] %v577_v27  ;;  %v1387_v29 = vpop.f32.mrb[7].mxu1  ;;  %1545 = vmatmul.mubr.f32.gmra.mrb[112].mxu1 %v159_v25 }
 0x12a   :  { %1358 = vmatprep.mubr.msk.f32.mxu0 %vm1687_vm0, %v1688_v1  ;;  %1547 = vmatprep.mubr.msk.f32.mxu1 %vm1687_vm0, %v1688_v1 }
 0x12c   :  { %v267_v32 = vpop.f32.mrb[8].mxu0  ;;  %v582_v33 = vpop.f32.mrb[8].mxu1 }
 0x12d   :  { %875 = vst [vmem:[#allocation7 + $0x20] sm:$0xff] %v267_v32  ;;  %v1201_v34 = vpop.f32.mrb[9].mxu0  ;;  %1359 = vmatmul.mubr.f32.gmra.mrb[114].mxu0 %v97_v30  ;;  %938 = vst [vmem:[#allocation7 + $0x218] sm:$0xff] %v582_v33  ;;  %v1390_v35 = vpop.f32.mrb[9].mxu1  ;;  %1548 = vmatmul.mubr.f32.gmra.mrb[114].mxu1 %v160_v31 }
 0x12e   :  { %1361 = vmatprep.mubr.msk.f32.mxu0 %vm1687_vm0, %v1688_v1  ;;  %1550 = vmatprep.mubr.msk.f32.mxu1 %vm1687_vm0, %v1688_v1 }
 0x130   :  { %v272_v38 = vpop.f32.mrb[10].mxu0  ;;  %v587_v39 = vpop.f32.mrb[10].mxu1 }
 0x131   :  { %876 = vst [vmem:[#allocation7 + $0x28] sm:$0xff] %v272_v38  ;;  %v1204_v40 = vpop.f32.mrb[11].mxu0  ;;  %1362 = vmatmul.mubr.f32.gmra.mrb[116].mxu0 %v98_v36  ;;  %939 = vst [vmem:[#allocation7 + $0x220] sm:$0xff] %v587_v39  ;;  %v1393_v41 = vpop.f32.mrb[11].mxu1  ;;  %1551 = vmatmul.mubr.f32.gmra.mrb[116].mxu1 %v161_v37 }
 0x132   :  { %1364 = vmatprep.mubr.msk.f32.mxu0 %vm1687_vm0, %v1688_v1  ;;  %1553 = vmatprep.mubr.msk.f32.mxu1 %vm1687_vm0, %v1688_v1 }
 0x134   :  { %v277_v44 = vpop.f32.mrb[12].mxu0  ;;  %v592_v45 = vpop.f32.mrb[12].mxu1 }
 0x135   :  { %877 = vst [vmem:[#allocation7 + $0x30] sm:$0xff] %v277_v44  ;;  %v1207_v46 = vpop.f32.mrb[13].mxu0  ;;  %1365 = vmatmul.mubr.f32.gmra.mrb[118].mxu0 %v99_v42  ;;  %940 = vst [vmem:[#allocation7 + $0x228] sm:$0xff] %v592_v45  ;;  %v1396_v47 = vpop.f32.mrb[13].mxu1  ;;  %1554 = vmatmul.mubr.f32.gmra.mrb[118].mxu1 %v162_v43 }
 0x136   :  { %1367 = vmatprep.mubr.msk.f32.mxu0 %vm1687_vm0, %v1688_v1  ;;  %1556 = vmatprep.mubr.msk.f32.mxu1 %vm1687_vm0, %v1688_v1 }
 0x138   :  { %v282_v50 = vpop.f32.mrb[14].mxu0  ;;  %v597_v51 = vpop.f32.mrb[14].mxu1 }
 0x139   :  { %878 = vst [vmem:[#allocation7 + $0x38] sm:$0xff] %v282_v50  ;;  %v1210_v52 = vpop.f32.mrb[15].mxu0  ;;  %1368 = vmatmul.mubr.f32.gmra.mrb[120].mxu0 %v100_v48  ;;  %941 = vst [vmem:[#allocation7 + $0x230] sm:$0xff] %v597_v51  ;;  %v1399_v53 = vpop.f32.mrb[15].mxu1  ;;  %1557 = vmatmul.mubr.f32.gmra.mrb[120].mxu1 %v163_v49 }
 0x13a   :  { %1370 = vmatprep.mubr.msk.f32.mxu0 %vm1687_vm0, %v1688_v1  ;;  %1559 = vmatprep.mubr.msk.f32.mxu1 %vm1687_vm0, %v1688_v1 }
 0x13c   :  { %v287_v56 = vpop.f32.mrb[16].mxu0  ;;  %v602_v57 = vpop.f32.mrb[16].mxu1 }
 0x13d   :  { %879 = vst [vmem:[#allocation7 + $0x40] sm:$0xff] %v287_v56  ;;  %v1213_v58 = vpop.f32.mrb[17].mxu0  ;;  %1371 = vmatmul.mubr.f32.gmra.mrb[122].mxu0 %v101_v54  ;;  %942 = vst [vmem:[#allocation7 + $0x238] sm:$0xff] %v602_v57  ;;  %v1402_v59 = vpop.f32.mrb[17].mxu1  ;;  %1560 = vmatmul.mubr.f32.gmra.mrb[122].mxu1 %v164_v55 }
 0x13e   :  { %1373 = vmatprep.mubr.msk.f32.mxu0 %vm1687_vm0, %v1688_v1 }
 0x140   :  { %v292_v61 = vpop.f32.mrb[18].mxu0  ;;  %v607_v62 = vpop.f32.mrb[18].mxu1 }
 0x141   :  { %880 = vst [vmem:[#allocation7 + $0x48] sm:$0xff] %v292_v61  ;;  %v1216_v63 = vpop.f32.mrb[19].mxu0  ;;  %1374 = vmatmul.mubr.f32.gmra.mrb[124].mxu0 %v102_v60  ;;  %943 = vst [vmem:[#allocation7 + $0x240] sm:$0xff] %v607_v62  ;;  %v1405_v0 = vpop.f32.mrb[19].mxu1 }
 0x144   :  { %v297_v2 = vpop.f32.mrb[20].mxu0  ;;  %v612_v3 = vpop.f32.mrb[20].mxu1 }
 0x145   :  { %881 = vst [vmem:[#allocation7 + $0x50] sm:$0xff] %v297_v2  ;;  %v1219_v4 = vpop.f32.mrb[21].mxu0  ;;  %944 = vst [vmem:[#allocation7 + $0x248] sm:$0xff] %v612_v3  ;;  %v1408_v5 = vpop.f32.mrb[21].mxu1 }
 0x148   :  { %v302_v6 = vpop.f32.mrb[22].mxu0  ;;  %v617_v7 = vpop.f32.mrb[22].mxu1 }
 0x149   :  { %882 = vst [vmem:[#allocation7 + $0x58] sm:$0xff] %v302_v6  ;;  %v1222_v8 = vpop.f32.mrb[23].mxu0  ;;  %945 = vst [vmem:[#allocation7 + $0x250] sm:$0xff] %v617_v7  ;;  %v1411_v1 = vpop.f32.mrb[23].mxu1 }
 0x14c   :  { %v307_v9 = vpop.f32.mrb[24].mxu0  ;;  %v622_v10 = vpop.f32.mrb[24].mxu1 }
 0x14d   :  { %883 = vst [vmem:[#allocation7 + $0x60] sm:$0xff] %v307_v9  ;;  %v1225_v11 = vpop.f32.mrb[25].mxu0  ;;  %946 = vst [vmem:[#allocation7 + $0x258] sm:$0xff] %v622_v10  ;;  %v1414_v12 = vpop.f32.mrb[25].mxu1 }
 0x150   :  { %v312_v13 = vpop.f32.mrb[26].mxu0  ;;  %v627_v14 = vpop.f32.mrb[26].mxu1 }
 0x151   :  { %884 = vst [vmem:[#allocation7 + $0x68] sm:$0xff] %v312_v13  ;;  %v1228_v15 = vpop.f32.mrb[27].mxu0  ;;  %947 = vst [vmem:[#allocation7 + $0x260] sm:$0xff] %v627_v14  ;;  %v1417_v16 = vpop.f32.mrb[27].mxu1 }
 0x154   :  { %v317_v17 = vpop.f32.mrb[28].mxu0  ;;  %v632_v18 = vpop.f32.mrb[28].mxu1 }
 0x155   :  { %885 = vst [vmem:[#allocation7 + $0x70] sm:$0xff] %v317_v17  ;;  %v1231_v19 = vpop.f32.mrb[29].mxu0  ;;  %948 = vst [vmem:[#allocation7 + $0x268] sm:$0xff] %v632_v18  ;;  %v1420_v20 = vpop.f32.mrb[29].mxu1 }
 0x158   :  { %v322_v21 = vpop.f32.mrb[30].mxu0  ;;  %v637_v22 = vpop.f32.mrb[30].mxu1 }
 0x159   :  { %886 = vst [vmem:[#allocation7 + $0x78] sm:$0xff] %v322_v21  ;;  %v1234_v23 = vpop.f32.mrb[31].mxu0  ;;  %949 = vst [vmem:[#allocation7 + $0x270] sm:$0xff] %v637_v22  ;;  %v1423_v24 = vpop.f32.mrb[31].mxu1 }
 0x15c   :  { %v327_v25 = vpop.f32.mrb[32].mxu0  ;;  %v642_v26 = vpop.f32.mrb[32].mxu1 }
 0x15d   :  { %887 = vst [vmem:[#allocation7 + $0x80] sm:$0xff] %v327_v25  ;;  %v1237_v27 = vpop.f32.mrb[33].mxu0  ;;  %950 = vst [vmem:[#allocation7 + $0x278] sm:$0xff] %v642_v26  ;;  %v1426_v28 = vpop.f32.mrb[33].mxu1 }
 0x160   :  { %v332_v29 = vpop.f32.mrb[34].mxu0  ;;  %v647_v30 = vpop.f32.mrb[34].mxu1 }
 0x161   :  { %888 = vst [vmem:[#allocation7 + $0x88] sm:$0xff] %v332_v29  ;;  %v1240_v31 = vpop.f32.mrb[35].mxu0  ;;  %951 = vst [vmem:[#allocation7 + $0x280] sm:$0xff] %v647_v30  ;;  %v1429_v32 = vpop.f32.mrb[35].mxu1 }
 0x164   :  { %v337_v33 = vpop.f32.mrb[36].mxu0  ;;  %v652_v34 = vpop.f32.mrb[36].mxu1 }
 0x165   :  { %889 = vst [vmem:[#allocation7 + $0x90] sm:$0xff] %v337_v33  ;;  %v1243_v35 = vpop.f32.mrb[37].mxu0  ;;  %952 = vst [vmem:[#allocation7 + $0x288] sm:$0xff] %v652_v34  ;;  %v1432_v36 = vpop.f32.mrb[37].mxu1 }
 0x168   :  { %v342_v37 = vpop.f32.mrb[38].mxu0  ;;  %v657_v38 = vpop.f32.mrb[38].mxu1 }
 0x169   :  { %890 = vst [vmem:[#allocation7 + $0x98] sm:$0xff] %v342_v37  ;;  %v1246_v39 = vpop.f32.mrb[39].mxu0  ;;  %953 = vst [vmem:[#allocation7 + $0x290] sm:$0xff] %v657_v38  ;;  %v1435_v40 = vpop.f32.mrb[39].mxu1 }
 0x16c   :  { %v347_v41 = vpop.f32.mrb[40].mxu0  ;;  %v662_v42 = vpop.f32.mrb[40].mxu1 }
 0x16d   :  { %891 = vst [vmem:[#allocation7 + $0xa0] sm:$0xff] %v347_v41  ;;  %v1249_v43 = vpop.f32.mrb[41].mxu0  ;;  %954 = vst [vmem:[#allocation7 + $0x298] sm:$0xff] %v662_v42  ;;  %v1438_v44 = vpop.f32.mrb[41].mxu1 }
 0x170   :  { %v352_v45 = vpop.f32.mrb[42].mxu0  ;;  %v667_v46 = vpop.f32.mrb[42].mxu1 }
 0x171   :  { %892 = vst [vmem:[#allocation7 + $0xa8] sm:$0xff] %v352_v45  ;;  %v1252_v47 = vpop.f32.mrb[43].mxu0  ;;  %955 = vst [vmem:[#allocation7 + $0x2a0] sm:$0xff] %v667_v46  ;;  %v1441_v48 = vpop.f32.mrb[43].mxu1 }
 0x174   :  { %v357_v49 = vpop.f32.mrb[44].mxu0  ;;  %v672_v50 = vpop.f32.mrb[44].mxu1 }
 0x175   :  { %893 = vst [vmem:[#allocation7 + $0xb0] sm:$0xff] %v357_v49  ;;  %v1255_v51 = vpop.f32.mrb[45].mxu0  ;;  %956 = vst [vmem:[#allocation7 + $0x2a8] sm:$0xff] %v672_v50  ;;  %v1444_v52 = vpop.f32.mrb[45].mxu1 }
 0x178   :  { %v362_v53 = vpop.f32.mrb[46].mxu0  ;;  %v677_v54 = vpop.f32.mrb[46].mxu1 }
 0x179   :  { %894 = vst [vmem:[#allocation7 + $0xb8] sm:$0xff] %v362_v53  ;;  %v1258_v55 = vpop.f32.mrb[47].mxu0  ;;  %957 = vst [vmem:[#allocation7 + $0x2b0] sm:$0xff] %v677_v54  ;;  %v1447_v56 = vpop.f32.mrb[47].mxu1 }
 0x17c   :  { %v367_v57 = vpop.f32.mrb[48].mxu0  ;;  %v682_v58 = vpop.f32.mrb[48].mxu1 }
 0x17d   :  { %895 = vst [vmem:[#allocation7 + $0xc0] sm:$0xff] %v367_v57  ;;  %v1261_v59 = vpop.f32.mrb[49].mxu0  ;;  %958 = vst [vmem:[#allocation7 + $0x2b8] sm:$0xff] %v682_v58  ;;  %v1450_v60 = vpop.f32.mrb[49].mxu1 }
 0x180   :  { %v372_v61 = vpop.f32.mrb[50].mxu0  ;;  %v687_v62 = vpop.f32.mrb[50].mxu1 }
 0x181   :  { %896 = vst [vmem:[#allocation7 + $0xc8] sm:$0xff] %v372_v61  ;;  %v1264_v63 = vpop.f32.mrb[51].mxu0  ;;  %959 = vst [vmem:[#allocation7 + $0x2c0] sm:$0xff] %v687_v62  ;;  %v1453_v0 = vpop.f32.mrb[51].mxu1 }
 0x184   :  { %v377_v2 = vpop.f32.mrb[52].mxu0  ;;  %v692_v3 = vpop.f32.mrb[52].mxu1 }
 0x185   :  { %897 = vst [vmem:[#allocation7 + $0xd0] sm:$0xff] %v377_v2  ;;  %v1267_v4 = vpop.f32.mrb[53].mxu0  ;;  %960 = vst [vmem:[#allocation7 + $0x2c8] sm:$0xff] %v692_v3  ;;  %v1456_v5 = vpop.f32.mrb[53].mxu1 }
 0x188   :  { %v382_v6 = vpop.f32.mrb[54].mxu0  ;;  %v697_v7 = vpop.f32.mrb[54].mxu1 }
 0x189   :  { %898 = vst [vmem:[#allocation7 + $0xd8] sm:$0xff] %v382_v6  ;;  %v1270_v8 = vpop.f32.mrb[55].mxu0  ;;  %961 = vst [vmem:[#allocation7 + $0x2d0] sm:$0xff] %v697_v7  ;;  %v1459_v1 = vpop.f32.mrb[55].mxu1 }
 0x18c   :  { %v387_v9 = vpop.f32.mrb[56].mxu0  ;;  %v702_v10 = vpop.f32.mrb[56].mxu1 }
 0x18d   :  { %899 = vst [vmem:[#allocation7 + $0xe0] sm:$0xff] %v387_v9  ;;  %v1273_v11 = vpop.f32.mrb[57].mxu0  ;;  %962 = vst [vmem:[#allocation7 + $0x2d8] sm:$0xff] %v702_v10  ;;  %v1462_v12 = vpop.f32.mrb[57].mxu1 }
 0x190   :  { %v392_v13 = vpop.f32.mrb[58].mxu0  ;;  %v707_v14 = vpop.f32.mrb[58].mxu1 }
 0x191   :  { %900 = vst [vmem:[#allocation7 + $0xe8] sm:$0xff] %v392_v13  ;;  %v1276_v15 = vpop.f32.mrb[59].mxu0  ;;  %963 = vst [vmem:[#allocation7 + $0x2e0] sm:$0xff] %v707_v14  ;;  %v1465_v16 = vpop.f32.mrb[59].mxu1 }
 0x194   :  { %v397_v17 = vpop.f32.mrb[60].mxu0  ;;  %v712_v18 = vpop.f32.mrb[60].mxu1 }
 0x195   :  { %901 = vst [vmem:[#allocation7 + $0xf0] sm:$0xff] %v397_v17  ;;  %v1279_v19 = vpop.f32.mrb[61].mxu0  ;;  %964 = vst [vmem:[#allocation7 + $0x2e8] sm:$0xff] %v712_v18  ;;  %v1468_v20 = vpop.f32.mrb[61].mxu1 }
 0x198   :  { %v402_v21 = vpop.f32.mrb[62].mxu0  ;;  %v717_v22 = vpop.f32.mrb[62].mxu1 }
 0x199   :  { %902 = vst [vmem:[#allocation7 + $0xf8] sm:$0xff] %v402_v21  ;;  %v1282_v23 = vpop.f32.mrb[63].mxu0  ;;  %965 = vst [vmem:[#allocation7 + $0x2f0] sm:$0xff] %v717_v22  ;;  %v1471_v24 = vpop.f32.mrb[63].mxu1 }
 0x19c   :  { %v407_v25 = vpop.f32.mrb[64].mxu0  ;;  %v722_v26 = vpop.f32.mrb[64].mxu1 }
 0x19d   :  { %903 = vst [vmem:[#allocation7 + $0x100] sm:$0xff] %v407_v25  ;;  %v1285_v27 = vpop.f32.mrb[65].mxu0  ;;  %966 = vst [vmem:[#allocation7 + $0x2f8] sm:$0xff] %v722_v26  ;;  %v1474_v28 = vpop.f32.mrb[65].mxu1 }
 0x1a0   :  { %v412_v29 = vpop.f32.mrb[66].mxu0  ;;  %v727_v30 = vpop.f32.mrb[66].mxu1 }
 0x1a1   :  { %904 = vst [vmem:[#allocation7 + $0x108] sm:$0xff] %v412_v29  ;;  %v1288_v31 = vpop.f32.mrb[67].mxu0  ;;  %967 = vst [vmem:[#allocation7 + $0x300] sm:$0xff] %v727_v30  ;;  %v1477_v32 = vpop.f32.mrb[67].mxu1 }
 0x1a4   :  { %v417_v33 = vpop.f32.mrb[68].mxu0  ;;  %v732_v34 = vpop.f32.mrb[68].mxu1 }
 0x1a5   :  { %905 = vst [vmem:[#allocation7 + $0x110] sm:$0xff] %v417_v33  ;;  %v1291_v35 = vpop.f32.mrb[69].mxu0  ;;  %968 = vst [vmem:[#allocation7 + $0x308] sm:$0xff] %v732_v34  ;;  %v1480_v36 = vpop.f32.mrb[69].mxu1 }
 0x1a8   :  { %v422_v37 = vpop.f32.mrb[70].mxu0  ;;  %v737_v38 = vpop.f32.mrb[70].mxu1 }
 0x1a9   :  { %906 = vst [vmem:[#allocation7 + $0x118] sm:$0xff] %v422_v37  ;;  %v1294_v39 = vpop.f32.mrb[71].mxu0  ;;  %969 = vst [vmem:[#allocation7 + $0x310] sm:$0xff] %v737_v38  ;;  %v1483_v40 = vpop.f32.mrb[71].mxu1 }
 0x1ac   :  { %v427_v41 = vpop.f32.mrb[72].mxu0  ;;  %v742_v42 = vpop.f32.mrb[72].mxu1 }
 0x1ad   :  { %907 = vst [vmem:[#allocation7 + $0x120] sm:$0xff] %v427_v41  ;;  %v1297_v43 = vpop.f32.mrb[73].mxu0  ;;  %970 = vst [vmem:[#allocation7 + $0x318] sm:$0xff] %v742_v42  ;;  %v1486_v44 = vpop.f32.mrb[73].mxu1 }
 0x1b0   :  { %v432_v45 = vpop.f32.mrb[74].mxu0  ;;  %v747_v46 = vpop.f32.mrb[74].mxu1 }
 0x1b1   :  { %908 = vst [vmem:[#allocation7 + $0x128] sm:$0xff] %v432_v45  ;;  %v1300_v47 = vpop.f32.mrb[75].mxu0  ;;  %971 = vst [vmem:[#allocation7 + $0x320] sm:$0xff] %v747_v46  ;;  %v1489_v48 = vpop.f32.mrb[75].mxu1 }
 0x1b4   :  { %v437_v49 = vpop.f32.mrb[76].mxu0  ;;  %v752_v50 = vpop.f32.mrb[76].mxu1 }
 0x1b5   :  { %909 = vst [vmem:[#allocation7 + $0x130] sm:$0xff] %v437_v49  ;;  %v1303_v51 = vpop.f32.mrb[77].mxu0  ;;  %972 = vst [vmem:[#allocation7 + $0x328] sm:$0xff] %v752_v50  ;;  %v1492_v52 = vpop.f32.mrb[77].mxu1 }
 0x1b8   :  { %v442_v53 = vpop.f32.mrb[78].mxu0  ;;  %v757_v54 = vpop.f32.mrb[78].mxu1 }
 0x1b9   :  { %910 = vst [vmem:[#allocation7 + $0x138] sm:$0xff] %v442_v53  ;;  %v1306_v55 = vpop.f32.mrb[79].mxu0  ;;  %973 = vst [vmem:[#allocation7 + $0x330] sm:$0xff] %v757_v54  ;;  %v1495_v56 = vpop.f32.mrb[79].mxu1 }
 0x1bc   :  { %v447_v57 = vpop.f32.mrb[80].mxu0  ;;  %v762_v58 = vpop.f32.mrb[80].mxu1 }
 0x1bd   :  { %911 = vst [vmem:[#allocation7 + $0x140] sm:$0xff] %v447_v57  ;;  %v1309_v59 = vpop.f32.mrb[81].mxu0  ;;  %974 = vst [vmem:[#allocation7 + $0x338] sm:$0xff] %v762_v58  ;;  %v1498_v60 = vpop.f32.mrb[81].mxu1 }
 0x1c0   :  { %v452_v61 = vpop.f32.mrb[82].mxu0  ;;  %v767_v62 = vpop.f32.mrb[82].mxu1 }
 0x1c1   :  { %912 = vst [vmem:[#allocation7 + $0x148] sm:$0xff] %v452_v61  ;;  %v1312_v63 = vpop.f32.mrb[83].mxu0  ;;  %975 = vst [vmem:[#allocation7 + $0x340] sm:$0xff] %v767_v62  ;;  %v1501_v0 = vpop.f32.mrb[83].mxu1 }
 0x1c4   :  { %v457_v2 = vpop.f32.mrb[84].mxu0  ;;  %v772_v3 = vpop.f32.mrb[84].mxu1 }
 0x1c5   :  { %913 = vst [vmem:[#allocation7 + $0x150] sm:$0xff] %v457_v2  ;;  %v1315_v4 = vpop.f32.mrb[85].mxu0  ;;  %976 = vst [vmem:[#allocation7 + $0x348] sm:$0xff] %v772_v3  ;;  %v1504_v5 = vpop.f32.mrb[85].mxu1 }
 0x1c8   :  { %v462_v6 = vpop.f32.mrb[86].mxu0  ;;  %v777_v7 = vpop.f32.mrb[86].mxu1 }
 0x1c9   :  { %914 = vst [vmem:[#allocation7 + $0x158] sm:$0xff] %v462_v6  ;;  %v1318_v8 = vpop.f32.mrb[87].mxu0  ;;  %977 = vst [vmem:[#allocation7 + $0x350] sm:$0xff] %v777_v7  ;;  %v1507_v1 = vpop.f32.mrb[87].mxu1 }
 0x1cc   :  { %v467_v9 = vpop.f32.mrb[88].mxu0  ;;  %v782_v10 = vpop.f32.mrb[88].mxu1 }
 0x1cd   :  { %915 = vst [vmem:[#allocation7 + $0x160] sm:$0xff] %v467_v9  ;;  %v1321_v11 = vpop.f32.mrb[89].mxu0  ;;  %978 = vst [vmem:[#allocation7 + $0x358] sm:$0xff] %v782_v10  ;;  %v1510_v12 = vpop.f32.mrb[89].mxu1 }
 0x1d0   :  { %v472_v13 = vpop.f32.mrb[90].mxu0  ;;  %v787_v14 = vpop.f32.mrb[90].mxu1 }
 0x1d1   :  { %916 = vst [vmem:[#allocation7 + $0x168] sm:$0xff] %v472_v13  ;;  %v1324_v15 = vpop.f32.mrb[91].mxu0  ;;  %979 = vst [vmem:[#allocation7 + $0x360] sm:$0xff] %v787_v14  ;;  %v1513_v16 = vpop.f32.mrb[91].mxu1 }
 0x1d4   :  { %v477_v17 = vpop.f32.mrb[92].mxu0  ;;  %v792_v18 = vpop.f32.mrb[92].mxu1 }
 0x1d5   :  { %917 = vst [vmem:[#allocation7 + $0x170] sm:$0xff] %v477_v17  ;;  %v1327_v19 = vpop.f32.mrb[93].mxu0  ;;  %980 = vst [vmem:[#allocation7 + $0x368] sm:$0xff] %v792_v18  ;;  %v1516_v20 = vpop.f32.mrb[93].mxu1 }
 0x1d8   :  { %v482_v21 = vpop.f32.mrb[94].mxu0  ;;  %v797_v22 = vpop.f32.mrb[94].mxu1 }
 0x1d9   :  { %918 = vst [vmem:[#allocation7 + $0x178] sm:$0xff] %v482_v21  ;;  %v1330_v23 = vpop.f32.mrb[95].mxu0  ;;  %981 = vst [vmem:[#allocation7 + $0x370] sm:$0xff] %v797_v22  ;;  %v1519_v24 = vpop.f32.mrb[95].mxu1 }
 0x1dc   :  { %v487_v25 = vpop.f32.mrb[96].mxu0  ;;  %v802_v26 = vpop.f32.mrb[96].mxu1 }
 0x1dd   :  { %919 = vst [vmem:[#allocation7 + $0x180] sm:$0xff] %v487_v25  ;;  %v1333_v27 = vpop.f32.mrb[97].mxu0  ;;  %982 = vst [vmem:[#allocation7 + $0x378] sm:$0xff] %v802_v26  ;;  %v1522_v28 = vpop.f32.mrb[97].mxu1 }
 0x1e0   :  { %v492_v29 = vpop.f32.mrb[98].mxu0  ;;  %v807_v30 = vpop.f32.mrb[98].mxu1 }
 0x1e1   :  { %920 = vst [vmem:[#allocation7 + $0x188] sm:$0xff] %v492_v29  ;;  %v1336_v31 = vpop.f32.mrb[99].mxu0  ;;  %983 = vst [vmem:[#allocation7 + $0x380] sm:$0xff] %v807_v30  ;;  %v1525_v32 = vpop.f32.mrb[99].mxu1 }
 0x1e4   :  { %v497_v33 = vpop.f32.mrb[100].mxu0  ;;  %v812_v34 = vpop.f32.mrb[100].mxu1 }
 0x1e5   :  { %921 = vst [vmem:[#allocation7 + $0x190] sm:$0xff] %v497_v33  ;;  %v1339_v35 = vpop.f32.mrb[101].mxu0  ;;  %984 = vst [vmem:[#allocation7 + $0x388] sm:$0xff] %v812_v34  ;;  %v1528_v36 = vpop.f32.mrb[101].mxu1 }
 0x1e8   :  { %v502_v37 = vpop.f32.mrb[102].mxu0  ;;  %v817_v38 = vpop.f32.mrb[102].mxu1 }
 0x1e9   :  { %922 = vst [vmem:[#allocation7 + $0x198] sm:$0xff] %v502_v37  ;;  %v1342_v39 = vpop.f32.mrb[103].mxu0  ;;  %985 = vst [vmem:[#allocation7 + $0x390] sm:$0xff] %v817_v38  ;;  %v1531_v40 = vpop.f32.mrb[103].mxu1 }
 0x1ec   :  { %v507_v41 = vpop.f32.mrb[104].mxu0  ;;  %v822_v42 = vpop.f32.mrb[104].mxu1 }
 0x1ed   :  { %923 = vst [vmem:[#allocation7 + $0x1a0] sm:$0xff] %v507_v41  ;;  %v1345_v43 = vpop.f32.mrb[105].mxu0  ;;  %986 = vst [vmem:[#allocation7 + $0x398] sm:$0xff] %v822_v42  ;;  %v1534_v44 = vpop.f32.mrb[105].mxu1 }
 0x1f0   :  { %v512_v45 = vpop.f32.mrb[106].mxu0  ;;  %v827_v46 = vpop.f32.mrb[106].mxu1 }
 0x1f1   :  { %924 = vst [vmem:[#allocation7 + $0x1a8] sm:$0xff] %v512_v45  ;;  %v1348_v47 = vpop.f32.mrb[107].mxu0  ;;  %987 = vst [vmem:[#allocation7 + $0x3a0] sm:$0xff] %v827_v46  ;;  %v1537_v48 = vpop.f32.mrb[107].mxu1 }
 0x1f4   :  { %v517_v49 = vpop.f32.mrb[108].mxu0  ;;  %v832_v50 = vpop.f32.mrb[108].mxu1 }
 0x1f5   :  { %925 = vst [vmem:[#allocation7 + $0x1b0] sm:$0xff] %v517_v49  ;;  %v1351_v51 = vpop.f32.mrb[109].mxu0  ;;  %988 = vst [vmem:[#allocation7 + $0x3a8] sm:$0xff] %v832_v50  ;;  %v1540_v52 = vpop.f32.mrb[109].mxu1 }
 0x1f8   :  { %v522_v53 = vpop.f32.mrb[110].mxu0  ;;  %v837_v54 = vpop.f32.mrb[110].mxu1 }
 0x1f9   :  { %926 = vst [vmem:[#allocation7 + $0x1b8] sm:$0xff] %v522_v53  ;;  %v1354_v55 = vpop.f32.mrb[111].mxu0  ;;  %989 = vst [vmem:[#allocation7 + $0x3b0] sm:$0xff] %v837_v54  ;;  %v1543_v56 = vpop.f32.mrb[111].mxu1 }
 0x1fc   :  { %v527_v57 = vpop.f32.mrb[112].mxu0  ;;  %v842_v58 = vpop.f32.mrb[112].mxu1 }
 0x1fd   :  { %927 = vst [vmem:[#allocation7 + $0x1c0] sm:$0xff] %v527_v57  ;;  %v1357_v59 = vpop.f32.mrb[113].mxu0  ;;  %990 = vst [vmem:[#allocation7 + $0x3b8] sm:$0xff] %v842_v58  ;;  %v1546_v60 = vpop.f32.mrb[113].mxu1 }
 0x200   :  { %v532_v61 = vpop.f32.mrb[114].mxu0  ;;  %v847_v62 = vpop.f32.mrb[114].mxu1 }
 0x201   :  { %928 = vst [vmem:[#allocation7 + $0x1c8] sm:$0xff] %v532_v61  ;;  %v1360_v63 = vpop.f32.mrb[115].mxu0  ;;  %991 = vst [vmem:[#allocation7 + $0x3c0] sm:$0xff] %v847_v62  ;;  %v1549_v0 = vpop.f32.mrb[115].mxu1 }
 0x204   :  { %v537_v2 = vpop.f32.mrb[116].mxu0  ;;  %v852_v3 = vpop.f32.mrb[116].mxu1 }
 0x205   :  { %929 = vst [vmem:[#allocation7 + $0x1d0] sm:$0xff] %v537_v2  ;;  %v1363_v4 = vpop.f32.mrb[117].mxu0  ;;  %992 = vst [vmem:[#allocation7 + $0x3c8] sm:$0xff] %v852_v3  ;;  %v1552_v5 = vpop.f32.mrb[117].mxu1 }
 0x208   :  { %v542_v6 = vpop.f32.mrb[118].mxu0  ;;  %v857_v7 = vpop.f32.mrb[118].mxu1 }
 0x209   :  { %930 = vst [vmem:[#allocation7 + $0x1d8] sm:$0xff] %v542_v6  ;;  %v1366_v8 = vpop.f32.mrb[119].mxu0  ;;  %993 = vst [vmem:[#allocation7 + $0x3d0] sm:$0xff] %v857_v7  ;;  %v1555_v1 = vpop.f32.mrb[119].mxu1 }
 0x20c   :  { %v547_v9 = vpop.f32.mrb[120].mxu0  ;;  %v862_v10 = vpop.f32.mrb[120].mxu1 }
 0x20d   :  { %931 = vst [vmem:[#allocation7 + $0x1e0] sm:$0xff] %v547_v9  ;;  %v1369_v11 = vpop.f32.mrb[121].mxu0  ;;  %994 = vst [vmem:[#allocation7 + $0x3d8] sm:$0xff] %v862_v10  ;;  %v1558_v12 = vpop.f32.mrb[121].mxu1 }
 0x210   :  { %v552_v13 = vpop.f32.mrb[122].mxu0  ;;  %v867_v14 = vpop.f32.mrb[122].mxu1 }
 0x211   :  { %932 = vst [vmem:[#allocation7 + $0x1e8] sm:$0xff] %v552_v13  ;;  %v1372_v15 = vpop.f32.mrb[123].mxu0  ;;  %995 = vst [vmem:[#allocation7 + $0x3e0] sm:$0xff] %v867_v14  ;;  %v1561_v16 = vpop.f32.mrb[123].mxu1 }
 0x214   :  { %v557_v17 = vpop.f32.mrb[124].mxu0 }
 0x215   :  { %933 = vst [vmem:[#allocation7 + $0x1f0] sm:$0xff] %v557_v17  ;;  %v1375_v18 = vpop.f32.mrb[125].mxu0 }
 0x216   :  { %1665 = shalt.err (!%p1662_p6)
}
 0x217   :  { %s1666_s10 = scalar_lea.hbm %s2002_s2, 16000 }
 0x218   :  { %p1667_p7 = scmp.ne.s32.totalorder %s2002_s2, %s1666_s10  ;;  %p1670_p8 = scmp.lt.u32.totalorder %s1666_s10, %s2002_s2 }
 0x21a   :  { %p1672_p9 = pnand %p1670_p8, %p1667_p7 }
 0x21c   :  { %1675 = shalt.err (!%p1672_p9)
}
 0x21d   :  { %1007 = dma.vmem_to_hbm [thread:$0]  %s1002_s6, 16000, %s2002_s2, [#allocation4], %s1683_s19, %s1683_s19, %s1684_s20  }
 0x21e   :  { %1680 = dma.done.wait [#allocation4], 16000  }
 0x21f   :  { %1681 = vsyncadd [#allocation4], 4294951296 }
 0x220   :  { %1011 = vsyncpa [#allocation3], 1 }
 0x221   :  { %1012 = vsyncpa [#allocation6], 1 }
 0x222   :  { %1013 = vsyncpa [#allocation4], 1 }

</bundles_post_ra>
